<compile_context>
chip_gen: v5e
topology: v5e:2x2
jax: 0.10.0
libtpu: 0.0.40
codegen_flags: <defaults>
</compile_context>

<pallas_src>
import functools
import math

import jax
import jax.numpy as jnp
from jax import lax
from jax.experimental import pallas as pl
from jax.experimental.pallas import tpu as pltpu

LN_EPS = 1e-5
_LANE = 128


def _round_up(v, m):
    return (v + m - 1) // m * m


def _tpu_vmem_bytes():
    """Per-TensorCore VMEM capacity; conservative 64 MiB (v7x) if unknown."""
    try:
        cap = getattr(pltpu.get_tpu_info(), "vmem_capacity_bytes", None)
        if cap:
            return int(cap)
    except Exception:
        pass
    return 64 << 20


def _gelu(x_f32, approximate, out_dtype):
    if approximate:
        # tanh form: lowers to the EUP (own VLIW slot); computed in the MXU
        # input dtype (bf16 VPU/EUP on v6e/v7x, upcast-neutral on v5e).
        x = x_f32.astype(out_dtype)
        c = math.sqrt(2.0 / math.pi)
        return 0.5 * x * (1.0 + jnp.tanh(c * (x + 0.044715 * (x * x * x))))
    # PyTorch nn.GELU default: exact erf, kept as an f32 VPU polynomial.
    y = 0.5 * x_f32 * (1.0 + lax.erf(x_f32 * (1.0 / math.sqrt(2.0))))
    return y.astype(out_dtype)


def _layernorm_stats(x_f32, size_in):
    """Single-pass, padding-aware moments: divide by the TRUE feature count."""
    inv_n = 1.0 / float(size_in)
    s1 = jnp.sum(x_f32, axis=-1, keepdims=True)
    s2 = jnp.sum(x_f32 * x_f32, axis=-1, keepdims=True)
    mu = s1 * inv_n
    var = s2 * inv_n - mu * mu
    rstd = lax.rsqrt(var + LN_EPS)
    return mu, rstd


# --------------------------------------------------------------------------
# Kernels
# --------------------------------------------------------------------------
def _resmlp_kernel_shortcut(x_ref, wcat_ref, bcat_ref, w2_ref, b2_ref, o_ref,
                            *, size_in, pad_h, approx_gelu):
    cdt = wcat_ref.dtype  # MXU input dtype (bf16 by default); accum stays f32.
    x = x_ref[...].astype(jnp.float32)
    mu, rstd = _layernorm_stats(x, size_in)
    # LN affine is folded into wcat/bcat on the host; padded lanes of xn are
    # garbage but the corresponding wcat rows are exact zeros.
    xn = ((x - mu) * rstd).astype(cdt)

    # One fused MXU contraction for fc1 AND the projection shortcut:
    # wcat = [diag(g1)@w1 | diag(g2)@ws], bcat = [b1 + be1@w1 | be2@ws].
    cat = jnp.dot(xn, wcat_ref[...],
                  preferred_element_type=jnp.float32) + bcat_ref[...]
    h = _gelu(cat[:, :pad_h], approx_gelu, cdt)   # 128-aligned static slice
    xs = cat[:, pad_h:]
    # TODO(synk): optional stage-2 K-concat ([h | xn] @ [[w2],[ws']]) skipped;
    # only profitable if the in-kernel activation concat beats the saved
    # matmul setup (bundle-check required).
    dx = jnp.dot(h, w2_ref[...],
                 preferred_element_type=jnp.float32) + b2_ref[...]
    o_ref[...] = (xs + dx).astype(o_ref.dtype)


def _resmlp_kernel_identity(x_ref, w1_ref, b1_ref, w2_ref, b2_ref, o_ref,
                            *, size_in, approx_gelu):
    cdt = w1_ref.dtype
    x = x_ref[...].astype(jnp.float32)
    mu, rstd = _layernorm_stats(x, size_in)
    xn = ((x - mu) * rstd).astype(cdt)

    h = jnp.dot(xn, w1_ref[...],
                preferred_element_type=jnp.float32) + b1_ref[...]
    h = _gelu(h, approx_gelu, cdt)
    dx = jnp.dot(h, w2_ref[...],
                 preferred_element_type=jnp.float32) + b2_ref[...]
    # x's padded columns and dx's padded columns are both exact zeros, so the
    # padded output columns are zeros -> lane-dense stores, wrapper slices.
    o_ref[...] = (x + dx).astype(o_ref.dtype)


# --------------------------------------------------------------------------
# Wrapper helpers
# --------------------------------------------------------------------------
def _const_spec(shape, single_buffer):
    """Full-array block, constant index_map -> fetched once, resident for all
    grid steps.  With single_buffer the 2x double-buffer reservation is halved
    (matters on v7x's 64 MiB VMEM)."""
    index_map = lambda i: (0,) * len(shape)
    if single_buffer:
        try:
            return pl.BlockSpec(shape, index_map,
                                pipeline_mode=pl.Buffered(buffer_count=1))
        except Exception:
            pass
    return pl.BlockSpec(shape, index_map)


def _choose_tm(n8, row_budget, row_bytes, tm_max, prefer_even_steps):
    """Largest row tile (multiple of 8) that fits the weight-aware VMEM row
    budget; balances tiles and (on 2-TC parts) prefers an even step count."""
    cap = (max(int(row_budget), 8 * int(row_bytes)) // max(int(row_bytes), 1))
    cap = max(8, cap // 8 * 8)
    tm = max(8, min(int(tm_max), n8, cap))
    steps = -(-n8 // tm)
    if prefer_even_steps and n8 > 8 and steps % 2 == 1:
        steps += 1
    # Re-balance so the last tile is not mostly padding.
    tm = max(8, _round_up(-(-n8 // steps), 8))
    return tm


# --------------------------------------------------------------------------
# Wrapper
# --------------------------------------------------------------------------
def resmlp_forward(x, params, *, tm=None, compute_dtype=jnp.bfloat16,
                   approximate_gelu=False, unpad_output=True,
                   single_buffer_weights=True):
    """x: (N, size_in).  params: raw parameter dict with nn.Linear weights
    pre-transposed to (in_features, out_features)."""
    N, size_in = x.shape
    hidden = params["w1"].shape[-1]
    size_out = params["w2"].shape[-1]
    has_shortcut = "ws" in params
    out_dtype = x.dtype
    f32 = jnp.float32
    cdt = jnp.dtype(compute_dtype)

    # ---- lane-dense zero padding of every feature dimension ----------------
    pad_in = _round_up(size_in, _LANE)
    pad_h = _round_up(hidden, _LANE)
    pad_out = _round_up(size_out, _LANE)

    # ---- fold LN affine into the first-stage weights (host, one-time) ------
    g1 = params["g1"].reshape(-1).astype(f32)
    be1 = params["be1"].reshape(1, -1).astype(f32)
    w1 = params["w1"].astype(f32)
    b1 = params["b1"].reshape(1, -1).astype(f32)
    w2 = params["w2"].astype(f32)
    b2 = params["b2"].reshape(1, -1).astype(f32)

    w1f = w1 * g1[:, None]
    b1f = b1 + jnp.matmul(be1, w1, precision=lax.Precision.HIGHEST)
    w1p = jnp.pad(w1f, ((0, pad_in - size_in), (0, pad_h - hidden))).astype(cdt)
    b1p = jnp.pad(b1f, ((0, 0), (0, pad_h - hidden)))
    w2p = jnp.pad(w2, ((0, pad_h - hidden), (0, pad_out - size_out))).astype(cdt)
    b2p = jnp.pad(b2, ((0, 0), (0, pad_out - size_out)))

    if has_shortcut:
        g2 = params["g2"].reshape(-1).astype(f32)
        be2 = params["be2"].reshape(1, -1).astype(f32)
        ws = params["ws"].astype(f32)
        wsf = ws * g2[:, None]
        bsf = jnp.matmul(be2, ws, precision=lax.Precision.HIGHEST)
        wsp = jnp.pad(wsf, ((0, pad_in - size_in),
                            (0, pad_out - size_out))).astype(cdt)
        bsp = jnp.pad(bsf, ((0, 0), (0, pad_out - size_out)))
        wcat = jnp.concatenate([w1p, wsp], axis=1)   # (pad_in, pad_h+pad_out)
        bcat = jnp.concatenate([b1p, bsp], axis=1)   # (1, pad_h+pad_out)
        wargs = (wcat, bcat, w2p, b2p)
        kernel = functools.partial(_resmlp_kernel_shortcut, size_in=size_in,
                                   pad_h=pad_h, approx_gelu=approximate_gelu)
        w_bytes = (pad_in * (pad_h + pad_out) + pad_h * pad_out) * cdt.itemsize \
            + 4 * (pad_h + 2 * pad_out)
    else:
        wargs = (w1p, b1p, w2p, b2p)
        kernel = functools.partial(_resmlp_kernel_identity, size_in=size_in,
                                   approx_gelu=approximate_gelu)
        w_bytes = (pad_in * pad_h + pad_h * pad_out) * cdt.itemsize \
            + 4 * (pad_h + pad_out)

    # ---- generation-aware VMEM budget & row tile ----------------------------
    x_item = jnp.dtype(x.dtype).itemsize
    out_item = jnp.dtype(out_dtype).itemsize
    vmem_cap = _tpu_vmem_bytes()                  # 128 MiB v5e/v6e, 64 MiB v7x
    nbuf_w = 1 if single_buffer_weights else 2
    target_vmem = min(vmem_cap - (8 << 20), 100 << 20)
    tm_max = 1024 if vmem_cap >= (96 << 20) else 512
    prefer_even = vmem_cap <= (80 << 20)          # proxy for v7x (2 TCs/chip)

    # Per-row working set: double-buffered x/out tiles + live f32/bf16
    # intermediates (x, xn, cat/h, dx, out cast), deliberately generous.
    row_bytes = (2 * pad_in * x_item + 2 * pad_out * out_item
                 + 4 * (2 * pad_in + pad_h + 3 * pad_out)
                 + cdt.itemsize * (pad_in + pad_h))
    row_budget = target_vmem - nbuf_w * w_bytes - (2 << 20)

    n8 = _round_up(max(int(N), 1), 8)
    if tm is None:
        tm = _choose_tm(n8, row_budget, row_bytes, tm_max, prefer_even)
    tm = max(8, _round_up(min(int(tm), n8), 8))
    n_pad = _round_up(N, tm)
    grid = (n_pad // tm,)

    # Single host-side pad covering both the row and the lane padding of x.
    xp = x
    if n_pad != N or pad_in != size_in:
        xp = jnp.pad(x, ((0, n_pad - N), (0, pad_in - size_in)))

    est = nbuf_w * w_bytes + tm * row_bytes + (4 << 20)
    vmem_limit = int(min(max(est, 32 << 20), vmem_cap - (4 << 20)))
    # TODO(synk): weights are fully resident; very large size_in/hidden would
    # need an extra K/N grid axis over the weights (not needed at these sizes).

    x_spec = pl.BlockSpec((tm, pad_in), lambda i: (i, 0))
    o_spec = pl.BlockSpec((tm, pad_out), lambda i: (i, 0))

    def _call(single_buf):
        in_specs = [x_spec] + [_const_spec(a.shape, single_buf) for a in wargs]
        return pl.pallas_call(
            kernel,
            out_shape=jax.ShapeDtypeStruct((n_pad, pad_out), out_dtype),
            grid_spec=pltpu.PrefetchScalarGridSpec(
                num_scalar_prefetch=0,
                grid=grid,
                in_specs=in_specs,
                out_specs=o_spec,
            ),
            compiler_params=pltpu.CompilerParams(
                dimension_semantics=("parallel",),
                vmem_limit_bytes=vmem_limit),
        )(xp, *wargs)

    if single_buffer_weights:
        try:
            out = _call(True)
        except Exception:
            # pl.Buffered(1) not supported by this jax/libtpu: double-buffer.
            out = _call(False)
    else:
        out = _call(False)

    if unpad_output and (n_pad != N or pad_out != size_out):
        out = out[:N, :size_out]
    return out


# --------------------------------------------------------------------------
# Deterministic parameter construction + pure-JAX reference.
# --------------------------------------------------------------------------
def make_params(key, size_in, size_out):
    """Synthetic parameters matching the PyTorch module (nn.Linear weights
    pre-transposed to (in_features, out_features)); hidden = size_in (timm Mlp
    default, as used by ResMlp)."""
    hidden = size_in
    keys = jax.random.split(key, 9)
    p = {
        "g1": 1.0 + 0.1 * jax.random.normal(keys[0], (1, size_in), jnp.float32),
        "be1": 0.1 * jax.random.normal(keys[1], (1, size_in), jnp.float32),
        "w1": jax.random.normal(keys[2], (size_in, hidden), jnp.float32)
        / math.sqrt(size_in),
        "b1": 0.1 * jax.random.normal(keys[3], (1, hidden), jnp.float32),
        "w2": jax.random.normal(keys[4], (hidden, size_out), jnp.float32)
        / math.sqrt(hidden),
        "b2": 0.1 * jax.random.normal(keys[5], (1, size_out), jnp.float32),
    }
    if size_in != size_out:
        p["g2"] = 1.0 + 0.1 * jax.random.normal(keys[6], (1, size_in), jnp.float32)
        p["be2"] = 0.1 * jax.random.normal(keys[7], (1, size_in), jnp.float32)
        p["ws"] = jax.random.normal(keys[8], (size_in, size_out), jnp.float32) \
            / math.sqrt(size_in)
    return p


def resmlp_ref(x, params, *, approximate_gelu=False):
    def ln(v, g, b):
        mu = jnp.mean(v, axis=-1, keepdims=True)
        var = jnp.mean((v - mu) ** 2, axis=-1, keepdims=True)
        return (v - mu) / jnp.sqrt(var + LN_EPS) * g + b

    h = ln(x, params["g1"], params["be1"])
    h = h @ params["w1"] + params["b1"]
    h = jax.nn.gelu(h, approximate=approximate_gelu)
    dx = h @ params["w2"] + params["b2"]
    if "ws" in params:
        xs = ln(x, params["g2"], params["be2"]) @ params["ws"]
    else:
        xs = x
    return xs + dx


if __name__ == "__main__":
    key = jax.random.PRNGKey(0)
    kx, kx2, kp1, kp2 = jax.random.split(key, 4)

    size_in, size_out = 32, 48          # size_in != size_out -> projection shortcut
    batch, seq = 2, 8
    x = jax.random.normal(kx, (batch, seq, size_in), jnp.float32)
    x2d = x.reshape(batch * seq, size_in)
    params = make_params(kp1, size_in, size_out)

    # ---- case 1: projection shortcut, f32 MXU inputs, exact-erf GELU ----
    out = jax.block_until_ready(
        resmlp_forward(x2d, params, compute_dtype=jnp.float32))
    ref = resmlp_ref(x2d, params)
    assert out.shape == (batch * seq, size_out)
    assert jnp.allclose(out, ref, atol=2e-4, rtol=2e-4), \
        float(jnp.max(jnp.abs(out - ref)))

    # ---- case 2: identity shortcut (size_in == size_out), f32 compute ----
    params_id = make_params(kp2, size_in, size_in)
    out_id = jax.block_until_ready(
        resmlp_forward(x2d, params_id, compute_dtype=jnp.float32))
    ref_id = resmlp_ref(x2d, params_id)
    assert out_id.shape == (batch * seq, size_in)
    assert jnp.allclose(out_id, ref_id, atol=2e-4, rtol=2e-4), \
        float(jnp.max(jnp.abs(out_id - ref_id)))

    # ---- case 3: default bf16 MXU path, ragged N, tanh GELU ----
    n_ragged = 13                        # not a multiple of 8 -> row padding path
    x3 = jax.random.normal(kx2, (n_ragged, size_in), jnp.float32)
    out_bf16 = jax.block_until_ready(
        resmlp_forward(x3, params, approximate_gelu=True))
    ref3 = resmlp_ref(x3, params, approximate_gelu=True)
    assert out_bf16.shape == (n_ragged, size_out)
    assert jnp.allclose(out_bf16, ref3, atol=7e-2, rtol=7e-2), \
        float(jnp.max(jnp.abs(out_bf16 - ref3)))

    # ---- case 4: default bf16 path, identity shortcut ----
    out_id_bf16 = jax.block_until_ready(resmlp_forward(x2d, params_id))
    assert jnp.allclose(out_id_bf16, ref_id, atol=7e-2, rtol=7e-2), \
        float(jnp.max(jnp.abs(out_id_bf16 - ref_id)))

    # TODO(synk): drop/drop_path are identity at 0.0 (eval); training-mode
    # dropout / stochastic depth are not implemented in the kernel.
    print("KERNEL_OK")
</pallas_src>

<mosaic_0001>
module attributes {stable_mosaic.version = 11 : i64} {
  func.func @_resmlp_kernel_shortcut(%arg0: i32, %arg1: memref<8x128xf32, #tpu.memory_space<vmem>>, %arg2: memref<128x256xf32, #tpu.memory_space<vmem>>, %arg3: memref<1x256xf32, #tpu.memory_space<vmem>>, %arg4: memref<128x128xf32, #tpu.memory_space<vmem>>, %arg5: memref<1x128xf32, #tpu.memory_space<vmem>>, %arg6: memref<8x128xf32, #tpu.memory_space<vmem>>) attributes {dimension_semantics = [#tpu.dimension_semantics<parallel>], iteration_bounds = array<i64: 2>, scalar_prefetch = 0 : i64, scratch_operands = 0 : i64, tpu.core_type = #tpu.core_type<tc>, window_params = [{transform_indices = @transform_0, window_bounds = array<i64: 8, 128>}, {pipeline_mode = #tpu.pipeline_mode<synchronous>, transform_indices = @transform_1, window_bounds = array<i64: 128, 256>}, {pipeline_mode = #tpu.pipeline_mode<synchronous>, transform_indices = @transform_2, window_bounds = array<i64: 1, 256>}, {pipeline_mode = #tpu.pipeline_mode<synchronous>, transform_indices = @transform_3, window_bounds = array<i64: 128, 128>}, {pipeline_mode = #tpu.pipeline_mode<synchronous>, transform_indices = @transform_4, window_bounds = array<i64: 1, 128>}, {transform_indices = @transform_5, window_bounds = array<i64: 8, 128>}]} {
    %c0 = arith.constant 0 : index
    %c0_0 = arith.constant 0 : index
    %0 = vector.load %arg1[%c0, %c0_0] : memref<8x128xf32, #tpu.memory_space<vmem>>, vector<8x128xf32>
    %cst = arith.constant dense<0.000000e+00> : vector<8xf32>
    %1 = vector.multi_reduction <add>, %0, %cst [1] : vector<8x128xf32> to vector<8xf32>
    %2 = vector.shape_cast %1 : vector<8xf32> to vector<8x1xf32>
    %3 = arith.mulf %0, %0 : vector<8x128xf32>
    %cst_1 = arith.constant dense<0.000000e+00> : vector<8xf32>
    %4 = vector.multi_reduction <add>, %3, %cst_1 [1] : vector<8x128xf32> to vector<8xf32>
    %5 = vector.shape_cast %4 : vector<8xf32> to vector<8x1xf32>
    %cst_2 = arith.constant 3.125000e-02 : f32
    %6 = vector.broadcast %cst_2 : f32 to vector<8x1xf32>
    %7 = arith.mulf %2, %6 : vector<8x1xf32>
    %cst_3 = arith.constant 3.125000e-02 : f32
    %8 = vector.broadcast %cst_3 : f32 to vector<8x1xf32>
    %9 = arith.mulf %5, %8 : vector<8x1xf32>
    %10 = arith.mulf %7, %7 : vector<8x1xf32>
    %11 = arith.subf %9, %10 : vector<8x1xf32>
    %cst_4 = arith.constant 9.99999974E-6 : f32
    %12 = vector.broadcast %cst_4 : f32 to vector<8x1xf32>
    %13 = arith.addf %11, %12 : vector<8x1xf32>
    %14 = math.rsqrt %13 : vector<8x1xf32>
    %15 = vector.broadcast %7 : vector<8x1xf32> to vector<8x128xf32>
    %16 = arith.subf %0, %15 : vector<8x128xf32>
    %17 = vector.broadcast %14 : vector<8x1xf32> to vector<8x128xf32>
    %18 = arith.mulf %16, %17 : vector<8x128xf32>
    %c0_5 = arith.constant 0 : index
    %c0_6 = arith.constant 0 : index
    %19 = vector.load %arg2[%c0_5, %c0_6] : memref<128x256xf32, #tpu.memory_space<vmem>>, vector<128x256xf32>
    %cst_7 = arith.constant dense<0.000000e+00> : vector<8x256xf32>
    %20 = tpu.matmul %18, %19, %cst_7 {dimension_numbers = #tpu.dot_dimension_numbers<[1], [0], [0], [1], [0, 0, 1, 1], [], []>} : vector<8x128xf32>, vector<128x256xf32>, vector<8x256xf32> -> vector<8x256xf32>
    %c0_8 = arith.constant 0 : index
    %c0_9 = arith.constant 0 : index
    %21 = vector.load %arg3[%c0_8, %c0_9] : memref<1x256xf32, #tpu.memory_space<vmem>>, vector<1x256xf32>
    %22 = vector.broadcast %21 : vector<1x256xf32> to vector<8x256xf32>
    %23 = arith.addf %20, %22 : vector<8x256xf32>
    %24 = vector.extract_strided_slice %23 {offsets = [0, 0], sizes = [8, 128], strides = [1, 1]} : vector<8x256xf32> to vector<8x128xf32>
    %cst_10 = arith.constant 5.000000e-01 : f32
    %25 = vector.broadcast %cst_10 : f32 to vector<8x128xf32>
    %26 = arith.mulf %25, %24 : vector<8x128xf32>
    %cst_11 = arith.constant 0.707106769 : f32
    %27 = vector.broadcast %cst_11 : f32 to vector<8x128xf32>
    %28 = arith.mulf %24, %27 : vector<8x128xf32>
    %29 = math.erf %28 : vector<8x128xf32>
    %cst_12 = arith.constant 1.000000e+00 : f32
    %30 = vector.broadcast %cst_12 : f32 to vector<8x128xf32>
    %31 = arith.addf %30, %29 : vector<8x128xf32>
    %32 = arith.mulf %26, %31 : vector<8x128xf32>
    %33 = vector.extract_strided_slice %23 {offsets = [0, 128], sizes = [8, 128], strides = [1, 1]} : vector<8x256xf32> to vector<8x128xf32>
    %c0_13 = arith.constant 0 : index
    %c0_14 = arith.constant 0 : index
    %34 = vector.load %arg4[%c0_13, %c0_14] : memref<128x128xf32, #tpu.memory_space<vmem>>, vector<128x128xf32>
    %cst_15 = arith.constant dense<0.000000e+00> : vector<8x128xf32>
    %35 = tpu.matmul %32, %34, %cst_15 {dimension_numbers = #tpu.dot_dimension_numbers<[1], [0], [0], [1], [0, 0, 1, 1], [], []>} : vector<8x128xf32>, vector<128x128xf32>, vector<8x128xf32> -> vector<8x128xf32>
    %c0_16 = arith.constant 0 : index
    %c0_17 = arith.constant 0 : index
    %36 = vector.load %arg5[%c0_16, %c0_17] : memref<1x128xf32, #tpu.memory_space<vmem>>, vector<1x128xf32>
    %37 = vector.broadcast %36 : vector<1x128xf32> to vector<8x128xf32>
    %38 = arith.addf %35, %37 : vector<8x128xf32>
    %39 = arith.addf %33, %38 : vector<8x128xf32>
    %c0_18 = arith.constant 0 : index
    %c0_19 = arith.constant 0 : index
    %40 = vector.load %arg6[%c0_18, %c0_19] : memref<8x128xf32, #tpu.memory_space<vmem>>, vector<8x128xf32>
    tpu.vector_store %arg6[%c0_18, %c0_19], %39 {strides = array<i32>} : memref<8x128xf32, #tpu.memory_space<vmem>>, vector<8x128xf32>,
    return
  }
  func.func @transform_0(%arg0: i32) -> (i32, i32) {
    %c0_i32 = arith.constant 0 : i32
    %c0_i32_0 = arith.constant 0 : i32
    return %arg0, %c0_i32 : i32, i32
  }
  func.func @transform_1(%arg0: i32) -> (i32, i32) {
    %c0_i32 = arith.constant 0 : i32
    %c0_i32_0 = arith.constant 0 : i32
    %c0_i32_1 = arith.constant 0 : i32
    return %c0_i32, %c0_i32_0 : i32, i32
  }
  func.func @transform_2(%arg0: i32) -> (i32, i32) {
    %c0_i32 = arith.constant 0 : i32
    %c0_i32_0 = arith.constant 0 : i32
    %c0_i32_1 = arith.constant 0 : i32
    return %c0_i32, %c0_i32_0 : i32, i32
  }
  func.func @transform_3(%arg0: i32) -> (i32, i32) {
    %c0_i32 = arith.constant 0 : i32
    %c0_i32_0 = arith.constant 0 : i32
    %c0_i32_1 = arith.constant 0 : i32
    return %c0_i32, %c0_i32_0 : i32, i32
  }
  func.func @transform_4(%arg0: i32) -> (i32, i32) {
    %c0_i32 = arith.constant 0 : i32
    %c0_i32_0 = arith.constant 0 : i32
    %c0_i32_1 = arith.constant 0 : i32
    return %c0_i32, %c0_i32_0 : i32, i32
  }
  func.func @transform_5(%arg0: i32) -> (i32, i32) {
    %c0_i32 = arith.constant 0 : i32
    %c0_i32_0 = arith.constant 0 : i32
    return %arg0, %c0_i32 : i32, i32
  }
}

module attributes {stable_mosaic.version = 11 : i64} {
  func.func @_resmlp_kernel_shortcut(%arg0: i32, %arg1: memref<8x128xf32, #tpu.memory_space<vmem>>, %arg2: memref<128x256xf32, #tpu.memory_space<vmem>>, %arg3: memref<1x256xf32, #tpu.memory_space<vmem>>, %arg4: memref<128x128xf32, #tpu.memory_space<vmem>>, %arg5: memref<1x128xf32, #tpu.memory_space<vmem>>, %arg6: memref<8x128xf32, #tpu.memory_space<vmem>>) attributes {dimension_semantics = [#tpu.dimension_semantics<parallel>], iteration_bounds = array<i64: 2>, scalar_prefetch = 0 : i64, scratch_operands = 0 : i64, tpu.core_type = #tpu.core_type<tc>, window_params = [{transform_indices = @transform_0, window_bounds = array<i64: 8, 128>}, {pipeline_mode = #tpu.pipeline_mode<synchronous>, transform_indices = @transform_1, window_bounds = array<i64: 128, 256>}, {pipeline_mode = #tpu.pipeline_mode<synchronous>, transform_indices = @transform_2, window_bounds = array<i64: 1, 256>}, {pipeline_mode = #tpu.pipeline_mode<synchronous>, transform_indices = @transform_3, window_bounds = array<i64: 128, 128>}, {pipeline_mode = #tpu.pipeline_mode<synchronous>, transform_indices = @transform_4, window_bounds = array<i64: 1, 128>}, {transform_indices = @transform_5, window_bounds = array<i64: 8, 128>}]} {
    %c0 = arith.constant 0 : index
    %c0_0 = arith.constant 0 : index
    %0 = vector.load %arg1[%c0, %c0_0] : memref<8x128xf32, #tpu.memory_space<vmem>>, vector<8x128xf32>
    %cst = arith.constant dense<0.000000e+00> : vector<8xf32>
    %1 = vector.multi_reduction <add>, %0, %cst [1] : vector<8x128xf32> to vector<8xf32>
    %2 = vector.shape_cast %1 : vector<8xf32> to vector<8x1xf32>
    %3 = arith.mulf %0, %0 : vector<8x128xf32>
    %cst_1 = arith.constant dense<0.000000e+00> : vector<8xf32>
    %4 = vector.multi_reduction <add>, %3, %cst_1 [1] : vector<8x128xf32> to vector<8xf32>
    %5 = vector.shape_cast %4 : vector<8xf32> to vector<8x1xf32>
    %cst_2 = arith.constant 3.125000e-02 : f32
    %6 = vector.broadcast %cst_2 : f32 to vector<8x1xf32>
    %7 = arith.mulf %2, %6 : vector<8x1xf32>
    %cst_3 = arith.constant 3.125000e-02 : f32
    %8 = vector.broadcast %cst_3 : f32 to vector<8x1xf32>
    %9 = arith.mulf %5, %8 : vector<8x1xf32>
    %10 = arith.mulf %7, %7 : vector<8x1xf32>
    %11 = arith.subf %9, %10 : vector<8x1xf32>
    %cst_4 = arith.constant 9.99999974E-6 : f32
    %12 = vector.broadcast %cst_4 : f32 to vector<8x1xf32>
    %13 = arith.addf %11, %12 : vector<8x1xf32>
    %14 = math.rsqrt %13 : vector<8x1xf32>
    %15 = vector.broadcast %7 : vector<8x1xf32> to vector<8x128xf32>
    %16 = arith.subf %0, %15 : vector<8x128xf32>
    %17 = vector.broadcast %14 : vector<8x1xf32> to vector<8x128xf32>
    %18 = arith.mulf %16, %17 : vector<8x128xf32>
    %c0_5 = arith.constant 0 : index
    %c0_6 = arith.constant 0 : index
    %19 = vector.load %arg2[%c0_5, %c0_6] : memref<128x256xf32, #tpu.memory_space<vmem>>, vector<128x256xf32>
    %cst_7 = arith.constant dense<0.000000e+00> : vector<8x256xf32>
    %20 = tpu.matmul %18, %19, %cst_7 {dimension_numbers = #tpu.dot_dimension_numbers<[1], [0], [0], [1], [0, 0, 1, 1], [], []>} : vector<8x128xf32>, vector<128x256xf32>, vector<8x256xf32> -> vector<8x256xf32>
    %c0_8 = arith.constant 0 : index
    %c0_9 = arith.constant 0 : index
    %21 = vector.load %arg3[%c0_8, %c0_9] : memref<1x256xf32, #tpu.memory_space<vmem>>, vector<1x256xf32>
    %22 = vector.broadcast %21 : vector<1x256xf32> to vector<8x256xf32>
    %23 = arith.addf %20, %22 : vector<8x256xf32>
    %24 = vector.extract_strided_slice %23 {offsets = [0, 0], sizes = [8, 128], strides = [1, 1]} : vector<8x256xf32> to vector<8x128xf32>
    %cst_10 = arith.constant 5.000000e-01 : f32
    %25 = vector.broadcast %cst_10 : f32 to vector<8x128xf32>
    %26 = arith.mulf %25, %24 : vector<8x128xf32>
    %cst_11 = arith.constant 0.707106769 : f32
    %27 = vector.broadcast %cst_11 : f32 to vector<8x128xf32>
    %28 = arith.mulf %24, %27 : vector<8x128xf32>
    %29 = math.erf %28 : vector<8x128xf32>
    %cst_12 = arith.constant 1.000000e+00 : f32
    %30 = vector.broadcast %cst_12 : f32 to vector<8x128xf32>
    %31 = arith.addf %30, %29 : vector<8x128xf32>
    %32 = arith.mulf %26, %31 : vector<8x128xf32>
    %33 = vector.extract_strided_slice %23 {offsets = [0, 128], sizes = [8, 128], strides = [1, 1]} : vector<8x256xf32> to vector<8x128xf32>
    %c0_13 = arith.constant 0 : index
    %c0_14 = arith.constant 0 : index
    %34 = vector.load %arg4[%c0_13, %c0_14] : memref<128x128xf32, #tpu.memory_space<vmem>>, vector<128x128xf32>
    %cst_15 = arith.constant dense<0.000000e+00> : vector<8x128xf32>
    %35 = tpu.matmul %32, %34, %cst_15 {dimension_numbers = #tpu.dot_dimension_numbers<[1], [0], [0], [1], [0, 0, 1, 1], [], []>} : vector<8x128xf32>, vector<128x128xf32>, vector<8x128xf32> -> vector<8x128xf32>
    %c0_16 = arith.constant 0 : index
    %c0_17 = arith.constant 0 : index
    %36 = vector.load %arg5[%c0_16, %c0_17] : memref<1x128xf32, #tpu.memory_space<vmem>>, vector<1x128xf32>
    %37 = vector.broadcast %36 : vector<1x128xf32> to vector<8x128xf32>
    %38 = arith.addf %35, %37 : vector<8x128xf32>
    %39 = arith.addf %33, %38 : vector<8x128xf32>
    %c0_18 = arith.constant 0 : index
    %c0_19 = arith.constant 0 : index
    %40 = vector.load %arg6[%c0_18, %c0_19] : memref<8x128xf32, #tpu.memory_space<vmem>>, vector<8x128xf32>
    tpu.vector_store %arg6[%c0_18, %c0_19], %39 {strides = array<i32>} : memref<8x128xf32, #tpu.memory_space<vmem>>, vector<8x128xf32>,
    return
  }
  func.func @transform_0(%arg0: i32) -> (i32, i32) {
    %c0_i32 = arith.constant 0 : i32
    %c0_i32_0 = arith.constant 0 : i32
    return %arg0, %c0_i32 : i32, i32
  }
  func.func @transform_1(%arg0: i32) -> (i32, i32) {
    %c0_i32 = arith.constant 0 : i32
    %c0_i32_0 = arith.constant 0 : i32
    %c0_i32_1 = arith.constant 0 : i32
    return %c0_i32, %c0_i32_0 : i32, i32
  }
  func.func @transform_2(%arg0: i32) -> (i32, i32) {
    %c0_i32 = arith.constant 0 : i32
    %c0_i32_0 = arith.constant 0 : i32
    %c0_i32_1 = arith.constant 0 : i32
    return %c0_i32, %c0_i32_0 : i32, i32
  }
  func.func @transform_3(%arg0: i32) -> (i32, i32) {
    %c0_i32 = arith.constant 0 : i32
    %c0_i32_0 = arith.constant 0 : i32
    %c0_i32_1 = arith.constant 0 : i32
    return %c0_i32, %c0_i32_0 : i32, i32
  }
  func.func @transform_4(%arg0: i32) -> (i32, i32) {
    %c0_i32 = arith.constant 0 : i32
    %c0_i32_0 = arith.constant 0 : i32
    %c0_i32_1 = arith.constant 0 : i32
    return %c0_i32, %c0_i32_0 : i32, i32
  }
  func.func @transform_5(%arg0: i32) -> (i32, i32) {
    %c0_i32 = arith.constant 0 : i32
    %c0_i32_0 = arith.constant 0 : i32
    return %arg0, %c0_i32 : i32, i32
  }
}

</mosaic_0001>

<bundles_post_ra>
// kernel: tpu_custom_call.1
= control target key start
LH: loop header
LB: loop body
LE: loop exit
PB: predicated region body
PF: predicated region fallthrough
CT: control target
= control target key end

     0   :  { %10 = vsyncpa [#allocation3], 0  ;;  %s1103_s0 = inlined_call_operand.hbm [shape: f32[16,128], index: 0, kind: input, shape index: {}]   ;;  %s1104_s1 = inlined_call_operand.hbm [shape: f32[128,256], index: 1, kind: input, shape index: {}]   ;;  %s1105_s2 = inlined_call_operand.hbm [shape: f32[1,256], index: 2, kind: input, shape index: {}]   ;;  %s1106_s3 = inlined_call_operand.hbm [shape: f32[128,128], index: 3, kind: input, shape index: {}]   ;;  %s1107_s4 = inlined_call_operand.vmem [shape: f32[1,128], index: 4, kind: input, shape index: {}]   ;;  %s1108_s5 = inlined_call_operand.hbm [shape: f32[16,128], index: 5, kind: output, shape index: {}]  }
   0x1   :  { %12 = vsyncpa [#allocation3 + $0x1], 0 }
   0x2   :  { %13 = vsyncpa [#allocation6], 0 }
   0x3   :  { %14 = vsyncpa [#allocation9], 0 }
   0x4   :  { %15 = vsyncpa [#allocation4], 0 }
   0x5   :  { %17 = vsyncpa [#allocation4 + $0x1], 0  ;;  %s930_s18 = smov 0   ;;  %s932_s19 = smov 0  }
   0x6   :  { %s934_s20 = smov 0   ;;  %s936_s21 = smov 0  }
   0x7 LB: > { %s175_s24 = sshll.u32 %s1104_s1, 4  ;;  %s954_s25 = sadd.s32 4294967295, %s891_s21   ;;  %s891_s21 = sphi %s936_s21, %s1119_s21   ;;  %s887_s20 = sphi %s934_s20, %s1118_s20   ;;  %s883_s19 = sphi %s932_s19, %s1117_s19   ;;  %s879_s18 = sphi %s930_s18, %s1116_s18   ;;  %s176_s24 = int_to_ptr.hbm [resolvable:$true] %s175_s24 }
   0x8   : > { %p593_p0 = scmp.ge.s32.totalorder %s891_s21, 1  ;;  %p44_p1 = scmp.eq.s32.totalorder %s954_s25, 0 }
   0x9   : > { %p164_p2 = scmp.lt.s32.totalorder %s891_s21, 3  ;;  %s893_s27 = smov [#allocation5]  }
   0xa   : > { %s177_s28 = sshll.u32 %s893_s27, 4  ;;  %s190_s6 = sshll.u32 %s1105_s2, 4  ;;  %s178_s28 = int_to_ptr.vmem [resolvable:$true] %s177_s28  ;;  %s191_s6 = int_to_ptr.hbm [resolvable:$true] %s190_s6 }
   0xb   : > { %p959_p3 = pnand %p593_p0, %p164_p2  ;;  %s201_s10 = sshll.u32 %s1106_s3, 4  ;;  %s202_s10 = int_to_ptr.hbm [resolvable:$true] %s201_s10 }
   0xc   : > { %s894_s11 = smov [#allocation7]   ;;  %s895_s13 = smov 256  }
   0xd   : > { %p627_p4 = pneg %p959_p3  ;;  %s192_s12 = sshll.u32 %s894_s11, 4  ;;  %s193_s12 = int_to_ptr.vmem [resolvable:$true] %s192_s12 }
   0xe   : > { %s896_s14 = smov 16   ;;  %s897_s15 = smov [#allocation8]  }
   0xf   : > { %p971_p6 = pnand %p627_p4, %p44_p1  ;;  %s203_s16 = sshll.u32 %s897_s15, 4  ;;  %s204_s16 = int_to_ptr.vmem [resolvable:$true] %s203_s16 }
  0x10   : > { %s898_s17 = smov 128   ;;  %s899_s22 = smov 8  }
  0x11   : > { %630 = dma.hbm_to_vmem [thread:$0]  (!%p971_p6), %s176_s24, 4096, %s178_s28, [#allocation6], %s895_s13, %s895_s13, %s896_s14  }
  0x12   : > { %633 = dma.hbm_to_vmem [thread:$0]  (!%p971_p6), %s191_s6, 32, %s193_s12, [#allocation6]  }
  0x13   : > { %636 = dma.hbm_to_vmem [thread:$0]  (!%p971_p6), %s202_s10, 2048, %s204_s16, [#allocation9], %s898_s17, %s898_s17, %s899_s22  }
  0x14   : > { %s592_s23 = sadd.s32 4294967294, %s891_s21   ;;  %s986_s24 = sadd.s32 1, %s891_s21  }
  0x15   : > { %s30_s27 = sadd.s32 1, %s887_s20  ;;  %s27_s28 = ssub.s32 %s891_s21, %s986_s24 }
  0x16   : > { %p37_p7 = scmp.ne.s32.totalorder %s887_s20, %s883_s19  ;;  %p28_p8 = scmp.eq.s32.totalorder %s27_s28, 0 }
  0x17   : > { %p38_p9 = scmp.eq.s32.totalorder %s891_s21, 0  ;;  %p43_p10 = scmp.ne.s32.totalorder %s883_s19, %s879_s18 }
  0x18   : > { %p151_p11 = scmp.eq.s32.totalorder %s954_s25, 1  ;;  %p157_p0 = scmp.eq.s32.totalorder %s592_s23, 1 }
  0x19   : > { %s998_s29 = scalar_select %p28_p8, %s887_s20, %s30_s27  }
  0x1a   : > { %p1002_p12 = por %p44_p1, %p43_p10  ;;  %p1006_p13 = por %p151_p11, %p37_p7 }
  0x1b   : > { %p39_p2 = por %p38_p9, %p37_p7  ;;  %s220_s7 = sand.u32 1, %s887_s20  }
  0x1c   : > { %p1011_p4 = por %p157_p0, %p43_p10  ;;  %p648_p6 = scmp.lt.s32.totalorder %s891_s21, 2 }
  0x1d   : > { %s598_s9 = sshll.u32 %s220_s7, 3  ;;  %s599_s10 = sshll.u32 %s891_s21, 3 }
  0x1e   : > { %s228_s13 = scalar_lea.hbm %s1103_s0, %s599_s10  ;;  %s224_s15 = scalar_lea.vmem [#allocation2], %s598_s9 }
  0x1f   : > { %s230_s14 = sshll.u32 %s228_s13, 4  ;;  %s232_s16 = sshll.u32 %s224_s15, 4  ;;  %s231_s14 = int_to_ptr.hbm [resolvable:$true] %s230_s14  ;;  %s233_s16 = int_to_ptr.vmem [resolvable:$true] %s232_s16 }
  0x20   : > { %p1020_p8 = pnand %p648_p6, %p39_p2  ;;  %s221_s22 = scalar_lea.sflag [#allocation3], %s220_s7 }
  0x21   : > { %s787_s23 = sshra.s32 %s231_s14, 4  ;;  %s794_s9 = scalar_lea.hbm %s1103_s0, 16  ;;  %s788_s23 = int_to_ptr.hbm [resolvable:$true] %s787_s23 }
  0x22   : > { %s789_s27 = scalar_lea.hbm %s788_s23, 8  ;;  %p791_p9 = pneg %p1020_p8 }
  0x23   : > { %p790_p7 = scmp.ne.s32.totalorder %s788_s23, %s789_s27  ;;  %p795_p0 = scmp.lt.s32.totalorder %s788_s23, %s1103_s0 }
  0x24   : > { %p796_p2 = scmp.lt.s32.totalorder %s794_s9, %s789_s27 }
  0x25   : > { %p792_p10 = pnand %p791_p9, %p790_p7 }
  0x26   : > { %p797_p6 = por %p796_p2, %p795_p0 }
  0x27   : > { %p793_p11 = pneg %p792_p10 }
  0x29   : > { %p798_p5 = pnand %p797_p6, %p793_p11 }
  0x2b   : > { %801 = shalt.err (!%p798_p5)
}
  0x2c   : > { %640 = dma.hbm_to_vmem [thread:$0]  (!%p1020_p8), %s231_s14, 128, %s233_s16, %s221_s22  }
  0x2d   : > { %241 = sbr.rel (%p959_p3) target bundleno = 524 (0x20c), region = 40  ;;  %s1037_s7 = sand.u32 (!%p959_p3), 1, %s883_s19  }
  0x2e   : > { %s601_s13 = sshll.u32 (!%p959_p3), %s1037_s7, 3  ;;  %s244_s15 = scalar_lea.sflag (!%p959_p3), [#allocation3], %s1037_s7 }
  0x2f   : > { %s247_s23 = scalar_lea.vmem (!%p959_p3), [#allocation2], %s601_s13 }
  0x32   : > { %862 = dma.done.wait (%p1002_p12), %s244_s15, 128  }
  0x33   : > { %864 = vsyncadd (%p1002_p12), %s244_s15, 4294967168 }
  0x34   : > { %866 = dma.done.wait (%p44_p1), [#allocation6], 4128  }
  0x35   : > { %868 = vsyncadd (%p44_p1), [#allocation6], 4294963168 }
  0x36   : > { %870 = dma.done.wait (%p44_p1), [#allocation9], 2048  }
  0x37   : > { %872 = vsyncadd (%p44_p1), [#allocation9], 4294965248  ;;  %v1055_v0 = vld [vmem:[%s247_s23] sm:$0xff]  ;;  %v341_v4 = vld [vmem:[#allocation5 + $0xe0] sm:$0xff]  ;;  %s608_s26 = sshll.u32 %s954_s25, 3  ;;  %s289_s27 = scalar_lea.vmem [#allocation10], %s601_s13 }
  0x38   : > { %291 = vadd.xlane.f32.xlu0 %v1055_v0  ;;  %v293_v1 = vmul.f32 %v1055_v0, %v1055_v0  ;;  %v343_v2 = vld [vmem:[#allocation5 + $0xf0] sm:$0xff]  ;;  %v344_v3 = vld [vmem:[#allocation5 + $0xf8] sm:$0xff]  ;;  %v342_v5 = vld [vmem:[#allocation5 + $0xe8] sm:$0xff]  ;;  %s488_s22 = scalar_lea.hbm %s1108_s5, %s608_s26  ;;  %s490_s28 = sshll.u32 %s289_s27, 4  ;;  %s491_s28 = int_to_ptr.vmem [resolvable:$true] %s490_s28 }
  0x39   : > { %351 = vmatpush.msra.mxu0 %v343_v2  ;;  %371 = vmatpush.msra.mxu1 %v344_v3  ;;  %v339_v6 = vld [vmem:[#allocation5 + $0xd0] sm:$0xff]  ;;  %v340_v7 = vld [vmem:[#allocation5 + $0xd8] sm:$0xff]  ;;  %v337_v8 = vld [vmem:[#allocation5 + $0xc0] sm:$0xff]  ;;  %s492_s10 = sshll.u32 %s488_s22, 4  ;;  %s478_s25 = scalar_lea.sflag [#allocation4], %s1037_s7  ;;  %s493_s10 = int_to_ptr.hbm [resolvable:$true] %s492_s10 }
  0x3a   : > { %v338_v9 = vld [vmem:[#allocation5 + $0xc8] sm:$0xff]  ;;  %v335_v10 = vld [vmem:[#allocation5 + $0xb0] sm:$0xff]  ;;  %v336_v11 = vld [vmem:[#allocation5 + $0xb8] sm:$0xff]  ;;  %s831_s9 = sshra.s32 %s493_s10, 4  ;;  %s837_s13 = scalar_lea.hbm %s1108_s5, 16  ;;  %s832_s9 = int_to_ptr.hbm [resolvable:$true] %s831_s9 }
  0x3b   : > { %352 = vmatpush.msra.mxu0 %v341_v4  ;;  %372 = vmatpush.msra.mxu1 %v342_v5  ;;  %v333_v12 = vld [vmem:[#allocation5 + $0xa0] sm:$0xff]  ;;  %v334_v13 = vld [vmem:[#allocation5 + $0xa8] sm:$0xff]  ;;  %v331_v14 = vld [vmem:[#allocation5 + $0x90] sm:$0xff]  ;;  %s833_s11 = scalar_lea.hbm %s832_s9, 8  ;;  %p838_p12 = scmp.lt.s32.totalorder %s832_s9, %s1108_s5 }
  0x3c   : > { %v332_v15 = vld [vmem:[#allocation5 + $0x98] sm:$0xff]  ;;  %v329_v16 = vld [vmem:[#allocation5 + $0x80] sm:$0xff]  ;;  %v330_v17 = vld [vmem:[#allocation5 + $0x88] sm:$0xff]  ;;  %p834_p1 = scmp.ne.s32.totalorder %s832_s9, %s833_s11  ;;  %p839_p8 = scmp.lt.s32.totalorder %s837_s13, %s833_s11 }
  0x3d   : > { %353 = vmatpush.msra.mxu0 %v339_v6  ;;  %373 = vmatpush.msra.mxu1 %v340_v7  ;;  %v327_v18 = vld [vmem:[#allocation5 + $0x70] sm:$0xff]  ;;  %v328_v19 = vld [vmem:[#allocation5 + $0x78] sm:$0xff]  ;;  %v325_v20 = vld [vmem:[#allocation5 + $0x60] sm:$0xff] }
  0x3e   : > { %v326_v21 = vld [vmem:[#allocation5 + $0x68] sm:$0xff]  ;;  %v323_v22 = vld [vmem:[#allocation5 + $0x50] sm:$0xff]  ;;  %v324_v23 = vld [vmem:[#allocation5 + $0x58] sm:$0xff]  ;;  %p835_p3 = pnand %p834_p1, %p1006_p13  ;;  %p840_p7 = por %p839_p8, %p838_p12 }
  0x3f   : > { %354 = vmatpush.msra.mxu0 %v337_v8  ;;  %374 = vmatpush.msra.mxu1 %v338_v9  ;;  %v321_v24 = vld [vmem:[#allocation5 + $0x40] sm:$0xff]  ;;  %v322_v25 = vld [vmem:[#allocation5 + $0x48] sm:$0xff]  ;;  %v319_v26 = vld [vmem:[#allocation5 + $0x30] sm:$0xff] }
  0x40   : > { %294 = vadd.xlane.f32.xlu0 %v293_v1  ;;  %v320_v27 = vld [vmem:[#allocation5 + $0x38] sm:$0xff]  ;;  %v317_v28 = vld [vmem:[#allocation5 + $0x20] sm:$0xff]  ;;  %v318_v29 = vld [vmem:[#allocation5 + $0x28] sm:$0xff]  ;;  %p836_p5 = pneg %p835_p3 }
  0x41   : > { %355 = vmatpush.msra.mxu0 %v335_v10  ;;  %375 = vmatpush.msra.mxu1 %v336_v11  ;;  %v315_v30 = vld [vmem:[#allocation5 + $0x10] sm:$0xff]  ;;  %v316_v31 = vld [vmem:[#allocation5 + $0x18] sm:$0xff]  ;;  %v313_v32 = vld [vmem:[#allocation5] sm:$0xff] }
  0x42   : > { %v314_v33 = vld [vmem:[#allocation5 + $0x8] sm:$0xff]  ;;  %v450_v50 = vld [vmem:[#allocation8 + $0x78] sm:$0xff]  ;;  %v449_v51 = vld [vmem:[#allocation8 + $0x70] sm:$0xff]  ;;  %p841_p9 = pnand %p840_p7, %p836_p5 }
  0x43   : > { %356 = vmatpush.msra.mxu0 %v333_v12  ;;  %376 = vmatpush.msra.mxu1 %v334_v13  ;;  %v1061_v52 = vld [vmem:[#allocation7] sm:$0x3]  ;;  %v448_v53 = vld [vmem:[#allocation8 + $0x68] sm:$0xff]  ;;  %v447_v54 = vld [vmem:[#allocation8 + $0x60] sm:$0xff] }
  0x44   : > { %455 = vmatpush.msra.mxu2 %v450_v50  ;;  %v347_v55 = vperm.slane %v1061_v52, 0  ;;  %v446_v56 = vld [vmem:[#allocation8 + $0x58] sm:$0xff]  ;;  %v445_v57 = vld [vmem:[#allocation8 + $0x50] sm:$0xff]  ;;  %v444_v59 = vld [vmem:[#allocation8 + $0x48] sm:$0xff] }
  0x45   : > { %357 = vmatpush.msra.mxu0 %v331_v14  ;;  %377 = vmatpush.msra.mxu1 %v332_v15  ;;  %v443_v61 = vld [vmem:[#allocation8 + $0x40] sm:$0xff]  ;;  %v442_v63 = vld [vmem:[#allocation8 + $0x38] sm:$0xff]  ;;  %v441_v1 = vld [vmem:[#allocation8 + $0x30] sm:$0xff] }
  0x46   : > { %456 = vmatpush.msra.mxu2 %v449_v51  ;;  %v440_v3 = vld [vmem:[#allocation8 + $0x28] sm:$0xff]  ;;  %v439_v6 = vld [vmem:[#allocation8 + $0x20] sm:$0xff]  ;;  %v438_v9 = vld [vmem:[#allocation8 + $0x18] sm:$0xff] }
  0x47   : > { %358 = vmatpush.msra.mxu0 %v329_v16  ;;  %378 = vmatpush.msra.mxu1 %v330_v17  ;;  %v437_v12 = vld [vmem:[#allocation8 + $0x10] sm:$0xff]  ;;  %v436_v15 = vld [vmem:[#allocation8 + $0x8] sm:$0xff]  ;;  %v435_v17 = vld [vmem:[#allocation8] sm:$0xff] }
  0x48   : > { %457 = vmatpush.msra.mxu2 %v448_v53 }
  0x49   : > { %359 = vmatpush.msra.mxu0 %v327_v18  ;;  %379 = vmatpush.msra.mxu1 %v328_v19 }
  0x4a   : > { %458 = vmatpush.msra.mxu2 %v447_v54 }
  0x4b   : > { %360 = vmatpush.msra.mxu0 %v325_v20  ;;  %380 = vmatpush.msra.mxu1 %v326_v21 }
  0x4c   : > { %459 = vmatpush.msra.mxu2 %v446_v56 }
  0x4d   : > { %361 = vmatpush.msra.mxu0 %v323_v22  ;;  %381 = vmatpush.msra.mxu1 %v324_v23 }
  0x4e   : > { %460 = vmatpush.msra.mxu2 %v445_v57 }
  0x4f   : > { %362 = vmatpush.msra.mxu0 %v321_v24  ;;  %382 = vmatpush.msra.mxu1 %v322_v25 }
  0x50   : > { %461 = vmatpush.msra.mxu2 %v444_v59 }
  0x51   : > { %363 = vmatpush.msra.mxu0 %v319_v26  ;;  %383 = vmatpush.msra.mxu1 %v320_v27 }
  0x52   : > { %462 = vmatpush.msra.mxu2 %v443_v61 }
  0x53   : > { %364 = vmatpush.msra.mxu0 %v317_v28  ;;  %384 = vmatpush.msra.mxu1 %v318_v29 }
  0x54   : > { %463 = vmatpush.msra.mxu2 %v442_v63 }
  0x55   : > { %365 = vmatpush.msra.mxu0 %v315_v30  ;;  %385 = vmatpush.msra.mxu1 %v316_v31 }
  0x56   : > { %464 = vmatpush.msra.mxu2 %v441_v1 }
  0x57   : > { %366 = vmatpush.msra.mxu0 %v313_v32  ;;  %386 = vmatpush.msra.mxu1 %v314_v33 }
  0x58   : > { %465 = vmatpush.msra.mxu2 %v440_v3 }
  0x5a   : > { %466 = vmatpush.msra.mxu2 %v439_v6 }
  0x5c   : > { %467 = vmatpush.msra.mxu2 %v438_v9 }
  0x5e   : > { %468 = vmatpush.msra.mxu2 %v437_v12 }
  0x60   : > { %469 = vmatpush.msra.mxu2 %v436_v15 }
  0x62   : > { %470 = vmatpush.msra.mxu2 %v435_v17 }
  0xab   : > { %v292_v34 = vpop.xlane.xlu0 %291 }
  0xac   : > { %v296_v35 = vmul.f32 0.03125, %v292_v34 }
  0xae   : > { %v298_v37 = vmul.f32 %v296_v35, %v296_v35  ;;  %v311_v47 = vsub.f32 %v1055_v0, %v296_v35 }
  0xb3   : > { %v295_v36 = vpop.xlane.xlu0 %294 }
  0xb4   : > { %v297_v38 = vmul.f32 0.03125, %v295_v36 }
  0xb6   : > { %v299_v39 = vsub.f32 %v297_v38, %v298_v37 }
  0xb8   : > { %v300_v40 = vadd.f32 1e-05, %v299_v39 }
  0xba   : > { %693 = vrsqrt.f32 %v300_v40  ;;  %vm307_vm1 = vweird.f32 %v300_v40 }
  0xc0   : > { %v694_v41 = vpop.eup %693 }
  0xc1   : > { %v302_v42 = vmul.f32 %v694_v41, %v300_v40  ;;  %vm308_vm0 = vweird.f32 %v694_v41 }
  0xc2   : > { %vm309_vm2 = vmor %vm307_vm1, %vm308_vm0 }
  0xc3   : > { %v303_v43 = vmul.f32 %v694_v41, %v302_v42 }
  0xc5   : > { %v304_v44 = vmul.f32 0.5, %v303_v43 }
  0xc7   : > { %v305_v45 = vsub.f32 1.5, %v304_v44 }
  0xc9   : > { %v306_v46 = vmul.f32 %v694_v41, %v305_v45  ;;  %v348_v45 = vperm.slane %v1061_v52, 1 }
  0xcb   : > { %v310_v48 = vsel %vm309_vm2, %v694_v41, %v306_v46  ;;  %v692_v46 = vld [vmem:[%s1107_s4] ss:$0 sm:$0xff] }
  0xcc   : > { %v312_v49 = vmul.f32 %v311_v47, %v310_v48 }
  0xce   : > { %367 = vmatmul.f32.vlgmr.msra.gmra.mxu0 %v312_v49  ;;  %387 = vmatmul.f32.vlgmr.msra.gmra.mxu1 %v312_v49 }
 0x14b   : > { %v368_v58 = vpop.f32.mrf.mxu0  ;;  %v388_v47 = vpop.f32.mrf.mxu1 }
 0x14c   : > { %v369_v60 = vadd.f32 %v368_v58, %v347_v55  ;;  %v389_v49 = vadd.f32 %v388_v47, %v348_v45 }
 0x14e   : > { %v392_v62 = vmul.f32 0.70710677, %v369_v60  ;;  %v391_v42 = vmul.f32 0.5, %v369_v60 }
 0x150   : > { %v393_v0 = vmul.f32 %v392_v62, %v392_v62 }
 0x152   : > { %v394_v2 = vmin.f32 %v393_v0, 16.0 }
 0x154   : > { %v395_v4 = vmul.f32 2.1237322e-06, %v394_v2  ;;  %v406_v5 = vmul.f32 3.8918573e-05, %v394_v2 }
 0x156   : > { %v396_v7 = vadd.f32 0.00028619796, %v395_v4  ;;  %v407_v8 = vadd.f32 0.001143296, %v406_v5 }
 0x158   : > { %v397_v10 = vmul.f32 %v396_v7, %v394_v2  ;;  %v408_v11 = vmul.f32 %v407_v8, %v394_v2 }
 0x15a   : > { %v409_v13 = vadd.f32 0.014752088, %v408_v11  ;;  %v398_v14 = vadd.f32 0.0036580483, %v397_v10 }
 0x15c   : > { %v410_v16 = vmul.f32 %v409_v13, %v394_v2  ;;  %v399_v19 = vmul.f32 %v398_v14, %v394_v2 }
 0x15e   : > { %v411_v18 = vadd.f32 0.112945676, %v410_v16  ;;  %v400_v22 = vadd.f32 0.05243302, %v399_v19 }
 0x160   : > { %v412_v20 = vmul.f32 %v411_v18, %v394_v2  ;;  %v401_v25 = vmul.f32 %v400_v22, %v394_v2 }
 0x162   : > { %v413_v21 = vadd.f32 0.4994258, %v412_v20  ;;  %v402_v26 = vadd.f32 0.18741608, %v401_v25 }
 0x164   : > { %v414_v23 = vmul.f32 %v413_v21, %v394_v2  ;;  %v403_v28 = vmul.f32 %v402_v26, %v394_v2 }
 0x166   : > { %v415_v24 = vadd.f32 1.0, %v414_v23  ;;  %v404_v32 = vadd.f32 1.1283791, %v403_v28 }
 0x168   : > { %695 = vrcp.f32 %v415_v24  ;;  %v427_v31 = vand.u32 2147483648, %v415_v24  ;;  %v425_v34 = vand.u32 2147483647, %v415_v24  ;;  %vm421_vm4 = vweird.f32 %v415_v24 }
 0x169   : > { %v405_v37 = vmul.f32 %v404_v32, %v392_v62 }
 0x16a   : > { %v428_v36 = vor.u32 1.1754944e-38, %v427_v31  ;;  %vm426_vm6 = vcmp.eq.f32.partialorder %v425_v34, 8.507059e+37 }
 0x16e   : > { %v696_v27 = vpop.eup %695 }
 0x16f   : > { %v417_v29 = vmul.f32 %v696_v27, %v415_v24  ;;  %vm422_vm3 = vweird.f32 %v696_v27 }
 0x170   : > { %vm423_vm5 = vmor %vm421_vm4, %vm422_vm3 }
 0x171   : > { %v418_v30 = vsub.f32 1.0, %v417_v29 }
 0x173   : > { %v419_v33 = vmul.f32 %v696_v27, %v418_v30 }
 0x175   : > { %v420_v35 = vadd.f32 %v696_v27, %v419_v33 }
 0x177   : > { %v424_v38 = vsel %vm423_vm5, %v696_v27, %v420_v35 }
 0x178   : > { %v429_v39 = vsel %vm426_vm6, %v428_v36, %v424_v38 }
 0x179   : > { %v430_v40 = vmul.f32 %v429_v39, %v405_v37 }
 0x17b   : > { %v606_v41 = vclamps-f32 %v430_v40, 1.0 }
 0x17d   : > { %v433_v43 = vadd.f32 1.0, %v606_v41 }
 0x17f   : > { %v434_v44 = vmul.f32 %v433_v43, %v391_v42 }
 0x181   : > { %471 = vmatmul.f32.vlgmr.msra.gmra.mxu2 %v434_v44 }
 0x204   : > { %v472_v48 = vpop.f32.mrf.mxu2 }
 0x205   : > { %v473_v50 = vadd.f32 %v692_v46, %v472_v48 }
 0x207   : > { %v475_v51 = vadd.f32 %v473_v50, %v389_v49 }
 0x209   : > { %476 = vst [vmem:[%s289_s27] sm:$0xff] %v475_v51 }
 0x20a   : > { %844 = shalt.err (!%p841_p9)
}
 0x20b   : > { %625 = dma.vmem_to_hbm [thread:$0]  (%p1006_p13), %s491_s28, 128, %s493_s10, %s478_s25  }
 0x20c PF: > { %s504_s7 = sand.u32 1, %s879_s18   ;;  %p1115_p10 = scmp.ge.s32.totalorder %s891_s21, 2 }
 0x20d   : > { %s505_s30 = scalar_lea.sflag [#allocation4], %s504_s7 }
 0x20e   : > { %p642_p11 = pnand %p1115_p10, %p1011_p4 }
 0x210   : > { %p643_p0 = pneg %p642_p11 }
 0x212   : > { %874 = dma.done.wait (%p643_p0), %s505_s30, 128  }
 0x213   : > { %876 = vsyncadd (%p643_p0), %s505_s30, 4294967168  ;;  %p20_p2 = scmp.ge.s32.totalorder %s986_s24, 4   ;;  %s1116_s18 = smov %s883_s19 }
 0x214   : > { %s1117_s19 = smov %s887_s20  ;;  %s1118_s20 = smov %s998_s29 }
 0x215   : > { %s1119_s21 = smov %s986_s24  ;;  %22 = sbr.rel (!%p20_p2) target bundleno = 7 (0x7), region = 97 }
 0x21a   :  { %511 = vsyncpa [#allocation3], 1 }
 0x21b   :  { %513 = vsyncpa [#allocation3 + $0x1], 1 }
 0x21c   :  { %514 = vsyncpa [#allocation6], 1 }
 0x21d   :  { %515 = vsyncpa [#allocation9], 1 }
 0x21e   :  { %516 = vsyncpa [#allocation4], 1 }
 0x21f   :  { %518 = vsyncpa [#allocation4 + $0x1], 1 }

// kernel: tpu_custom_call.1
= control target key start
LH: loop header
LB: loop body
LE: loop exit
PB: predicated region body
PF: predicated region fallthrough
CT: control target
= control target key end

     0   :  { %10 = vsyncpa [#allocation3], 0  ;;  %s1103_s0 = inlined_call_operand.hbm [shape: f32[16,128], index: 0, kind: input, shape index: {}]   ;;  %s1104_s1 = inlined_call_operand.hbm [shape: f32[128,256], index: 1, kind: input, shape index: {}]   ;;  %s1105_s2 = inlined_call_operand.hbm [shape: f32[1,256], index: 2, kind: input, shape index: {}]   ;;  %s1106_s3 = inlined_call_operand.hbm [shape: f32[128,128], index: 3, kind: input, shape index: {}]   ;;  %s1107_s4 = inlined_call_operand.vmem [shape: f32[1,128], index: 4, kind: input, shape index: {}]   ;;  %s1108_s5 = inlined_call_operand.hbm [shape: f32[16,128], index: 5, kind: output, shape index: {}]  }
   0x1   :  { %12 = vsyncpa [#allocation3 + $0x1], 0 }
   0x2   :  { %13 = vsyncpa [#allocation6], 0 }
   0x3   :  { %14 = vsyncpa [#allocation9], 0 }
   0x4   :  { %15 = vsyncpa [#allocation4], 0 }
   0x5   :  { %17 = vsyncpa [#allocation4 + $0x1], 0  ;;  %s930_s18 = smov 0   ;;  %s932_s19 = smov 0  }
   0x6   :  { %s934_s20 = smov 0   ;;  %s936_s21 = smov 0  }
   0x7 LB: > { %s175_s24 = sshll.u32 %s1104_s1, 4  ;;  %s954_s25 = sadd.s32 4294967295, %s891_s21   ;;  %s891_s21 = sphi %s936_s21, %s1119_s21   ;;  %s887_s20 = sphi %s934_s20, %s1118_s20   ;;  %s883_s19 = sphi %s932_s19, %s1117_s19   ;;  %s879_s18 = sphi %s930_s18, %s1116_s18   ;;  %s176_s24 = int_to_ptr.hbm [resolvable:$true] %s175_s24 }
   0x8   : > { %p593_p0 = scmp.ge.s32.totalorder %s891_s21, 1  ;;  %p44_p1 = scmp.eq.s32.totalorder %s954_s25, 0 }
   0x9   : > { %p164_p2 = scmp.lt.s32.totalorder %s891_s21, 3  ;;  %s893_s27 = smov [#allocation5]  }
   0xa   : > { %s177_s28 = sshll.u32 %s893_s27, 4  ;;  %s190_s6 = sshll.u32 %s1105_s2, 4  ;;  %s178_s28 = int_to_ptr.vmem [resolvable:$true] %s177_s28  ;;  %s191_s6 = int_to_ptr.hbm [resolvable:$true] %s190_s6 }
   0xb   : > { %p959_p3 = pnand %p593_p0, %p164_p2  ;;  %s201_s10 = sshll.u32 %s1106_s3, 4  ;;  %s202_s10 = int_to_ptr.hbm [resolvable:$true] %s201_s10 }
   0xc   : > { %s894_s11 = smov [#allocation7]   ;;  %s895_s13 = smov 256  }
   0xd   : > { %p627_p4 = pneg %p959_p3  ;;  %s192_s12 = sshll.u32 %s894_s11, 4  ;;  %s193_s12 = int_to_ptr.vmem [resolvable:$true] %s192_s12 }
   0xe   : > { %s896_s14 = smov 16   ;;  %s897_s15 = smov [#allocation8]  }
   0xf   : > { %p971_p6 = pnand %p627_p4, %p44_p1  ;;  %s203_s16 = sshll.u32 %s897_s15, 4  ;;  %s204_s16 = int_to_ptr.vmem [resolvable:$true] %s203_s16 }
  0x10   : > { %s898_s17 = smov 128   ;;  %s899_s22 = smov 8  }
  0x11   : > { %630 = dma.hbm_to_vmem [thread:$0]  (!%p971_p6), %s176_s24, 4096, %s178_s28, [#allocation6], %s895_s13, %s895_s13, %s896_s14  }
  0x12   : > { %633 = dma.hbm_to_vmem [thread:$0]  (!%p971_p6), %s191_s6, 32, %s193_s12, [#allocation6]  }
  0x13   : > { %636 = dma.hbm_to_vmem [thread:$0]  (!%p971_p6), %s202_s10, 2048, %s204_s16, [#allocation9], %s898_s17, %s898_s17, %s899_s22  }
  0x14   : > { %s592_s23 = sadd.s32 4294967294, %s891_s21   ;;  %s986_s24 = sadd.s32 1, %s891_s21  }
  0x15   : > { %s30_s27 = sadd.s32 1, %s887_s20  ;;  %s27_s28 = ssub.s32 %s891_s21, %s986_s24 }
  0x16   : > { %p37_p7 = scmp.ne.s32.totalorder %s887_s20, %s883_s19  ;;  %p28_p8 = scmp.eq.s32.totalorder %s27_s28, 0 }
  0x17   : > { %p38_p9 = scmp.eq.s32.totalorder %s891_s21, 0  ;;  %p43_p10 = scmp.ne.s32.totalorder %s883_s19, %s879_s18 }
  0x18   : > { %p151_p11 = scmp.eq.s32.totalorder %s954_s25, 1  ;;  %p157_p0 = scmp.eq.s32.totalorder %s592_s23, 1 }
  0x19   : > { %s998_s29 = scalar_select %p28_p8, %s887_s20, %s30_s27  }
  0x1a   : > { %p1002_p12 = por %p44_p1, %p43_p10  ;;  %p1006_p13 = por %p151_p11, %p37_p7 }
  0x1b   : > { %p39_p2 = por %p38_p9, %p37_p7  ;;  %s220_s7 = sand.u32 1, %s887_s20  }
  0x1c   : > { %p1011_p4 = por %p157_p0, %p43_p10  ;;  %p648_p6 = scmp.lt.s32.totalorder %s891_s21, 2 }
  0x1d   : > { %s598_s9 = sshll.u32 %s220_s7, 3  ;;  %s599_s10 = sshll.u32 %s891_s21, 3 }
  0x1e   : > { %s228_s13 = scalar_lea.hbm %s1103_s0, %s599_s10  ;;  %s224_s15 = scalar_lea.vmem [#allocation2], %s598_s9 }
  0x1f   : > { %s230_s14 = sshll.u32 %s228_s13, 4  ;;  %s232_s16 = sshll.u32 %s224_s15, 4  ;;  %s231_s14 = int_to_ptr.hbm [resolvable:$true] %s230_s14  ;;  %s233_s16 = int_to_ptr.vmem [resolvable:$true] %s232_s16 }
  0x20   : > { %p1020_p8 = pnand %p648_p6, %p39_p2  ;;  %s221_s22 = scalar_lea.sflag [#allocation3], %s220_s7 }
  0x21   : > { %s787_s23 = sshra.s32 %s231_s14, 4  ;;  %s794_s9 = scalar_lea.hbm %s1103_s0, 16  ;;  %s788_s23 = int_to_ptr.hbm [resolvable:$true] %s787_s23 }
  0x22   : > { %s789_s27 = scalar_lea.hbm %s788_s23, 8  ;;  %p791_p9 = pneg %p1020_p8 }
  0x23   : > { %p790_p7 = scmp.ne.s32.totalorder %s788_s23, %s789_s27  ;;  %p795_p0 = scmp.lt.s32.totalorder %s788_s23, %s1103_s0 }
  0x24   : > { %p796_p2 = scmp.lt.s32.totalorder %s794_s9, %s789_s27 }
  0x25   : > { %p792_p10 = pnand %p791_p9, %p790_p7 }
  0x26   : > { %p797_p6 = por %p796_p2, %p795_p0 }
  0x27   : > { %p793_p11 = pneg %p792_p10 }
  0x29   : > { %p798_p5 = pnand %p797_p6, %p793_p11 }
  0x2b   : > { %801 = shalt.err (!%p798_p5)
}
  0x2c   : > { %640 = dma.hbm_to_vmem [thread:$0]  (!%p1020_p8), %s231_s14, 128, %s233_s16, %s221_s22  }
  0x2d   : > { %241 = sbr.rel (%p959_p3) target bundleno = 524 (0x20c), region = 40  ;;  %s1037_s7 = sand.u32 (!%p959_p3), 1, %s883_s19  }
  0x2e   : > { %s601_s13 = sshll.u32 (!%p959_p3), %s1037_s7, 3  ;;  %s244_s15 = scalar_lea.sflag (!%p959_p3), [#allocation3], %s1037_s7 }
  0x2f   : > { %s247_s23 = scalar_lea.vmem (!%p959_p3), [#allocation2], %s601_s13 }
  0x32   : > { %862 = dma.done.wait (%p1002_p12), %s244_s15, 128  }
  0x33   : > { %864 = vsyncadd (%p1002_p12), %s244_s15, 4294967168 }
  0x34   : > { %866 = dma.done.wait (%p44_p1), [#allocation6], 4128  }
  0x35   : > { %868 = vsyncadd (%p44_p1), [#allocation6], 4294963168 }
  0x36   : > { %870 = dma.done.wait (%p44_p1), [#allocation9], 2048  }
  0x37   : > { %872 = vsyncadd (%p44_p1), [#allocation9], 4294965248  ;;  %v1055_v0 = vld [vmem:[%s247_s23] sm:$0xff]  ;;  %v341_v4 = vld [vmem:[#allocation5 + $0xe0] sm:$0xff]  ;;  %s608_s26 = sshll.u32 %s954_s25, 3  ;;  %s289_s27 = scalar_lea.vmem [#allocation10], %s601_s13 }
  0x38   : > { %291 = vadd.xlane.f32.xlu0 %v1055_v0  ;;  %v293_v1 = vmul.f32 %v1055_v0, %v1055_v0  ;;  %v343_v2 = vld [vmem:[#allocation5 + $0xf0] sm:$0xff]  ;;  %v344_v3 = vld [vmem:[#allocation5 + $0xf8] sm:$0xff]  ;;  %v342_v5 = vld [vmem:[#allocation5 + $0xe8] sm:$0xff]  ;;  %s488_s22 = scalar_lea.hbm %s1108_s5, %s608_s26  ;;  %s490_s28 = sshll.u32 %s289_s27, 4  ;;  %s491_s28 = int_to_ptr.vmem [resolvable:$true] %s490_s28 }
  0x39   : > { %351 = vmatpush.msra.mxu0 %v343_v2  ;;  %371 = vmatpush.msra.mxu1 %v344_v3  ;;  %v339_v6 = vld [vmem:[#allocation5 + $0xd0] sm:$0xff]  ;;  %v340_v7 = vld [vmem:[#allocation5 + $0xd8] sm:$0xff]  ;;  %v337_v8 = vld [vmem:[#allocation5 + $0xc0] sm:$0xff]  ;;  %s492_s10 = sshll.u32 %s488_s22, 4  ;;  %s478_s25 = scalar_lea.sflag [#allocation4], %s1037_s7  ;;  %s493_s10 = int_to_ptr.hbm [resolvable:$true] %s492_s10 }
  0x3a   : > { %v338_v9 = vld [vmem:[#allocation5 + $0xc8] sm:$0xff]  ;;  %v335_v10 = vld [vmem:[#allocation5 + $0xb0] sm:$0xff]  ;;  %v336_v11 = vld [vmem:[#allocation5 + $0xb8] sm:$0xff]  ;;  %s831_s9 = sshra.s32 %s493_s10, 4  ;;  %s837_s13 = scalar_lea.hbm %s1108_s5, 16  ;;  %s832_s9 = int_to_ptr.hbm [resolvable:$true] %s831_s9 }
  0x3b   : > { %352 = vmatpush.msra.mxu0 %v341_v4  ;;  %372 = vmatpush.msra.mxu1 %v342_v5  ;;  %v333_v12 = vld [vmem:[#allocation5 + $0xa0] sm:$0xff]  ;;  %v334_v13 = vld [vmem:[#allocation5 + $0xa8] sm:$0xff]  ;;  %v331_v14 = vld [vmem:[#allocation5 + $0x90] sm:$0xff]  ;;  %s833_s11 = scalar_lea.hbm %s832_s9, 8  ;;  %p838_p12 = scmp.lt.s32.totalorder %s832_s9, %s1108_s5 }
  0x3c   : > { %v332_v15 = vld [vmem:[#allocation5 + $0x98] sm:$0xff]  ;;  %v329_v16 = vld [vmem:[#allocation5 + $0x80] sm:$0xff]  ;;  %v330_v17 = vld [vmem:[#allocation5 + $0x88] sm:$0xff]  ;;  %p834_p1 = scmp.ne.s32.totalorder %s832_s9, %s833_s11  ;;  %p839_p8 = scmp.lt.s32.totalorder %s837_s13, %s833_s11 }
  0x3d   : > { %353 = vmatpush.msra.mxu0 %v339_v6  ;;  %373 = vmatpush.msra.mxu1 %v340_v7  ;;  %v327_v18 = vld [vmem:[#allocation5 + $0x70] sm:$0xff]  ;;  %v328_v19 = vld [vmem:[#allocation5 + $0x78] sm:$0xff]  ;;  %v325_v20 = vld [vmem:[#allocation5 + $0x60] sm:$0xff] }
  0x3e   : > { %v326_v21 = vld [vmem:[#allocation5 + $0x68] sm:$0xff]  ;;  %v323_v22 = vld [vmem:[#allocation5 + $0x50] sm:$0xff]  ;;  %v324_v23 = vld [vmem:[#allocation5 + $0x58] sm:$0xff]  ;;  %p835_p3 = pnand %p834_p1, %p1006_p13  ;;  %p840_p7 = por %p839_p8, %p838_p12 }
  0x3f   : > { %354 = vmatpush.msra.mxu0 %v337_v8  ;;  %374 = vmatpush.msra.mxu1 %v338_v9  ;;  %v321_v24 = vld [vmem:[#allocation5 + $0x40] sm:$0xff]  ;;  %v322_v25 = vld [vmem:[#allocation5 + $0x48] sm:$0xff]  ;;  %v319_v26 = vld [vmem:[#allocation5 + $0x30] sm:$0xff] }
  0x40   : > { %294 = vadd.xlane.f32.xlu0 %v293_v1  ;;  %v320_v27 = vld [vmem:[#allocation5 + $0x38] sm:$0xff]  ;;  %v317_v28 = vld [vmem:[#allocation5 + $0x20] sm:$0xff]  ;;  %v318_v29 = vld [vmem:[#allocation5 + $0x28] sm:$0xff]  ;;  %p836_p5 = pneg %p835_p3 }
  0x41   : > { %355 = vmatpush.msra.mxu0 %v335_v10  ;;  %375 = vmatpush.msra.mxu1 %v336_v11  ;;  %v315_v30 = vld [vmem:[#allocation5 + $0x10] sm:$0xff]  ;;  %v316_v31 = vld [vmem:[#allocation5 + $0x18] sm:$0xff]  ;;  %v313_v32 = vld [vmem:[#allocation5] sm:$0xff] }
  0x42   : > { %v314_v33 = vld [vmem:[#allocation5 + $0x8] sm:$0xff]  ;;  %v450_v50 = vld [vmem:[#allocation8 + $0x78] sm:$0xff]  ;;  %v449_v51 = vld [vmem:[#allocation8 + $0x70] sm:$0xff]  ;;  %p841_p9 = pnand %p840_p7, %p836_p5 }
  0x43   : > { %356 = vmatpush.msra.mxu0 %v333_v12  ;;  %376 = vmatpush.msra.mxu1 %v334_v13  ;;  %v1061_v52 = vld [vmem:[#allocation7] sm:$0x3]  ;;  %v448_v53 = vld [vmem:[#allocation8 + $0x68] sm:$0xff]  ;;  %v447_v54 = vld [vmem:[#allocation8 + $0x60] sm:$0xff] }
  0x44   : > { %455 = vmatpush.msra.mxu2 %v450_v50  ;;  %v347_v55 = vperm.slane %v1061_v52, 0  ;;  %v446_v56 = vld [vmem:[#allocation8 + $0x58] sm:$0xff]  ;;  %v445_v57 = vld [vmem:[#allocation8 + $0x50] sm:$0xff]  ;;  %v444_v59 = vld [vmem:[#allocation8 + $0x48] sm:$0xff] }
  0x45   : > { %357 = vmatpush.msra.mxu0 %v331_v14  ;;  %377 = vmatpush.msra.mxu1 %v332_v15  ;;  %v443_v61 = vld [vmem:[#allocation8 + $0x40] sm:$0xff]  ;;  %v442_v63 = vld [vmem:[#allocation8 + $0x38] sm:$0xff]  ;;  %v441_v1 = vld [vmem:[#allocation8 + $0x30] sm:$0xff] }
  0x46   : > { %456 = vmatpush.msra.mxu2 %v449_v51  ;;  %v440_v3 = vld [vmem:[#allocation8 + $0x28] sm:$0xff]  ;;  %v439_v6 = vld [vmem:[#allocation8 + $0x20] sm:$0xff]  ;;  %v438_v9 = vld [vmem:[#allocation8 + $0x18] sm:$0xff] }
  0x47   : > { %358 = vmatpush.msra.mxu0 %v329_v16  ;;  %378 = vmatpush.msra.mxu1 %v330_v17  ;;  %v437_v12 = vld [vmem:[#allocation8 + $0x10] sm:$0xff]  ;;  %v436_v15 = vld [vmem:[#allocation8 + $0x8] sm:$0xff]  ;;  %v435_v17 = vld [vmem:[#allocation8] sm:$0xff] }
  0x48   : > { %457 = vmatpush.msra.mxu2 %v448_v53 }
  0x49   : > { %359 = vmatpush.msra.mxu0 %v327_v18  ;;  %379 = vmatpush.msra.mxu1 %v328_v19 }
  0x4a   : > { %458 = vmatpush.msra.mxu2 %v447_v54 }
  0x4b   : > { %360 = vmatpush.msra.mxu0 %v325_v20  ;;  %380 = vmatpush.msra.mxu1 %v326_v21 }
  0x4c   : > { %459 = vmatpush.msra.mxu2 %v446_v56 }
  0x4d   : > { %361 = vmatpush.msra.mxu0 %v323_v22  ;;  %381 = vmatpush.msra.mxu1 %v324_v23 }
  0x4e   : > { %460 = vmatpush.msra.mxu2 %v445_v57 }
  0x4f   : > { %362 = vmatpush.msra.mxu0 %v321_v24  ;;  %382 = vmatpush.msra.mxu1 %v322_v25 }
  0x50   : > { %461 = vmatpush.msra.mxu2 %v444_v59 }
  0x51   : > { %363 = vmatpush.msra.mxu0 %v319_v26  ;;  %383 = vmatpush.msra.mxu1 %v320_v27 }
  0x52   : > { %462 = vmatpush.msra.mxu2 %v443_v61 }
  0x53   : > { %364 = vmatpush.msra.mxu0 %v317_v28  ;;  %384 = vmatpush.msra.mxu1 %v318_v29 }
  0x54   : > { %463 = vmatpush.msra.mxu2 %v442_v63 }
  0x55   : > { %365 = vmatpush.msra.mxu0 %v315_v30  ;;  %385 = vmatpush.msra.mxu1 %v316_v31 }
  0x56   : > { %464 = vmatpush.msra.mxu2 %v441_v1 }
  0x57   : > { %366 = vmatpush.msra.mxu0 %v313_v32  ;;  %386 = vmatpush.msra.mxu1 %v314_v33 }
  0x58   : > { %465 = vmatpush.msra.mxu2 %v440_v3 }
  0x5a   : > { %466 = vmatpush.msra.mxu2 %v439_v6 }
  0x5c   : > { %467 = vmatpush.msra.mxu2 %v438_v9 }
  0x5e   : > { %468 = vmatpush.msra.mxu2 %v437_v12 }
  0x60   : > { %469 = vmatpush.msra.mxu2 %v436_v15 }
  0x62   : > { %470 = vmatpush.msra.mxu2 %v435_v17 }
  0xab   : > { %v292_v34 = vpop.xlane.xlu0 %291 }
  0xac   : > { %v296_v35 = vmul.f32 0.03125, %v292_v34 }
  0xae   : > { %v298_v37 = vmul.f32 %v296_v35, %v296_v35  ;;  %v311_v47 = vsub.f32 %v1055_v0, %v296_v35 }
  0xb3   : > { %v295_v36 = vpop.xlane.xlu0 %294 }
  0xb4   : > { %v297_v38 = vmul.f32 0.03125, %v295_v36 }
  0xb6   : > { %v299_v39 = vsub.f32 %v297_v38, %v298_v37 }
  0xb8   : > { %v300_v40 = vadd.f32 1e-05, %v299_v39 }
  0xba   : > { %693 = vrsqrt.f32 %v300_v40  ;;  %vm307_vm1 = vweird.f32 %v300_v40 }
  0xc0   : > { %v694_v41 = vpop.eup %693 }
  0xc1   : > { %v302_v42 = vmul.f32 %v694_v41, %v300_v40  ;;  %vm308_vm0 = vweird.f32 %v694_v41 }
  0xc2   : > { %vm309_vm2 = vmor %vm307_vm1, %vm308_vm0 }
  0xc3   : > { %v303_v43 = vmul.f32 %v694_v41, %v302_v42 }
  0xc5   : > { %v304_v44 = vmul.f32 0.5, %v303_v43 }
  0xc7   : > { %v305_v45 = vsub.f32 1.5, %v304_v44 }
  0xc9   : > { %v306_v46 = vmul.f32 %v694_v41, %v305_v45  ;;  %v348_v45 = vperm.slane %v1061_v52, 1 }
  0xcb   : > { %v310_v48 = vsel %vm309_vm2, %v694_v41, %v306_v46  ;;  %v692_v46 = vld [vmem:[%s1107_s4] ss:$0 sm:$0xff] }
  0xcc   : > { %v312_v49 = vmul.f32 %v311_v47, %v310_v48 }
  0xce   : > { %367 = vmatmul.f32.vlgmr.msra.gmra.mxu0 %v312_v49  ;;  %387 = vmatmul.f32.vlgmr.msra.gmra.mxu1 %v312_v49 }
 0x14b   : > { %v368_v58 = vpop.f32.mrf.mxu0  ;;  %v388_v47 = vpop.f32.mrf.mxu1 }
 0x14c   : > { %v369_v60 = vadd.f32 %v368_v58, %v347_v55  ;;  %v389_v49 = vadd.f32 %v388_v47, %v348_v45 }
 0x14e   : > { %v392_v62 = vmul.f32 0.70710677, %v369_v60  ;;  %v391_v42 = vmul.f32 0.5, %v369_v60 }
 0x150   : > { %v393_v0 = vmul.f32 %v392_v62, %v392_v62 }
 0x152   : > { %v394_v2 = vmin.f32 %v393_v0, 16.0 }
 0x154   : > { %v395_v4 = vmul.f32 2.1237322e-06, %v394_v2  ;;  %v406_v5 = vmul.f32 3.8918573e-05, %v394_v2 }
 0x156   : > { %v396_v7 = vadd.f32 0.00028619796, %v395_v4  ;;  %v407_v8 = vadd.f32 0.001143296, %v406_v5 }
 0x158   : > { %v397_v10 = vmul.f32 %v396_v7, %v394_v2  ;;  %v408_v11 = vmul.f32 %v407_v8, %v394_v2 }
 0x15a   : > { %v409_v13 = vadd.f32 0.014752088, %v408_v11  ;;  %v398_v14 = vadd.f32 0.0036580483, %v397_v10 }
 0x15c   : > { %v410_v16 = vmul.f32 %v409_v13, %v394_v2  ;;  %v399_v19 = vmul.f32 %v398_v14, %v394_v2 }
 0x15e   : > { %v411_v18 = vadd.f32 0.112945676, %v410_v16  ;;  %v400_v22 = vadd.f32 0.05243302, %v399_v19 }
 0x160   : > { %v412_v20 = vmul.f32 %v411_v18, %v394_v2  ;;  %v401_v25 = vmul.f32 %v400_v22, %v394_v2 }
 0x162   : > { %v413_v21 = vadd.f32 0.4994258, %v412_v20  ;;  %v402_v26 = vadd.f32 0.18741608, %v401_v25 }
 0x164   : > { %v414_v23 = vmul.f32 %v413_v21, %v394_v2  ;;  %v403_v28 = vmul.f32 %v402_v26, %v394_v2 }
 0x166   : > { %v415_v24 = vadd.f32 1.0, %v414_v23  ;;  %v404_v32 = vadd.f32 1.1283791, %v403_v28 }
 0x168   : > { %695 = vrcp.f32 %v415_v24  ;;  %v427_v31 = vand.u32 2147483648, %v415_v24  ;;  %v425_v34 = vand.u32 2147483647, %v415_v24  ;;  %vm421_vm4 = vweird.f32 %v415_v24 }
 0x169   : > { %v405_v37 = vmul.f32 %v404_v32, %v392_v62 }
 0x16a   : > { %v428_v36 = vor.u32 1.1754944e-38, %v427_v31  ;;  %vm426_vm6 = vcmp.eq.f32.partialorder %v425_v34, 8.507059e+37 }
 0x16e   : > { %v696_v27 = vpop.eup %695 }
 0x16f   : > { %v417_v29 = vmul.f32 %v696_v27, %v415_v24  ;;  %vm422_vm3 = vweird.f32 %v696_v27 }
 0x170   : > { %vm423_vm5 = vmor %vm421_vm4, %vm422_vm3 }
 0x171   : > { %v418_v30 = vsub.f32 1.0, %v417_v29 }
 0x173   : > { %v419_v33 = vmul.f32 %v696_v27, %v418_v30 }
 0x175   : > { %v420_v35 = vadd.f32 %v696_v27, %v419_v33 }
 0x177   : > { %v424_v38 = vsel %vm423_vm5, %v696_v27, %v420_v35 }
 0x178   : > { %v429_v39 = vsel %vm426_vm6, %v428_v36, %v424_v38 }
 0x179   : > { %v430_v40 = vmul.f32 %v429_v39, %v405_v37 }
 0x17b   : > { %v606_v41 = vclamps-f32 %v430_v40, 1.0 }
 0x17d   : > { %v433_v43 = vadd.f32 1.0, %v606_v41 }
 0x17f   : > { %v434_v44 = vmul.f32 %v433_v43, %v391_v42 }
 0x181   : > { %471 = vmatmul.f32.vlgmr.msra.gmra.mxu2 %v434_v44 }
 0x204   : > { %v472_v48 = vpop.f32.mrf.mxu2 }
 0x205   : > { %v473_v50 = vadd.f32 %v692_v46, %v472_v48 }
 0x207   : > { %v475_v51 = vadd.f32 %v473_v50, %v389_v49 }
 0x209   : > { %476 = vst [vmem:[%s289_s27] sm:$0xff] %v475_v51 }
 0x20a   : > { %844 = shalt.err (!%p841_p9)
}
 0x20b   : > { %625 = dma.vmem_to_hbm [thread:$0]  (%p1006_p13), %s491_s28, 128, %s493_s10, %s478_s25  }
 0x20c PF: > { %s504_s7 = sand.u32 1, %s879_s18   ;;  %p1115_p10 = scmp.ge.s32.totalorder %s891_s21, 2 }
 0x20d   : > { %s505_s30 = scalar_lea.sflag [#allocation4], %s504_s7 }
 0x20e   : > { %p642_p11 = pnand %p1115_p10, %p1011_p4 }
 0x210   : > { %p643_p0 = pneg %p642_p11 }
 0x212   : > { %874 = dma.done.wait (%p643_p0), %s505_s30, 128  }
 0x213   : > { %876 = vsyncadd (%p643_p0), %s505_s30, 4294967168  ;;  %p20_p2 = scmp.ge.s32.totalorder %s986_s24, 4   ;;  %s1116_s18 = smov %s883_s19 }
 0x214   : > { %s1117_s19 = smov %s887_s20  ;;  %s1118_s20 = smov %s998_s29 }
 0x215   : > { %s1119_s21 = smov %s986_s24  ;;  %22 = sbr.rel (!%p20_p2) target bundleno = 7 (0x7), region = 97 }
 0x21a   :  { %511 = vsyncpa [#allocation3], 1 }
 0x21b   :  { %513 = vsyncpa [#allocation3 + $0x1], 1 }
 0x21c   :  { %514 = vsyncpa [#allocation6], 1 }
 0x21d   :  { %515 = vsyncpa [#allocation9], 1 }
 0x21e   :  { %516 = vsyncpa [#allocation4], 1 }
 0x21f   :  { %518 = vsyncpa [#allocation4 + $0x1], 1 }

</bundles_post_ra>
